<compile_context>
chip_gen: v5e
topology: v5e:2x2
jax: 0.10.0
libtpu: 0.0.40
codegen_flags: <defaults>
</compile_context>

<pallas_src>
import functools

import jax
import jax.numpy as jnp
from jax.experimental import pallas as pl
from jax.experimental.pallas import tpu as pltpu


# ---------------------------------------------------------------------------
# Kernels
# ---------------------------------------------------------------------------

def _mvn_scalar_kernel(s_ref, x_ref, o_ref):
    """(x - mean) * inv_var with scalar stats read from SMEM (s = [mean, inv_var])."""
    x = x_ref[...].astype(jnp.float32)
    o_ref[...] = ((x - s_ref[0]) * s_ref[1]).astype(o_ref.dtype)


def _mvn_rowstat_kernel(m_ref, iv_ref, x_ref, o_ref, *, block_rows):
    """Per-row stats; m_ref/iv_ref are the full (R_pad, 1) arrays kept resident
    in VMEM (constant index_map) and sliced in-kernel -> no tiny per-step DMAs."""
    start = pl.program_id(0) * block_rows
    if block_rows % 8 == 0:
        start = pl.multiple_of(start, 8)
    m = m_ref[pl.ds(start, block_rows), :]
    iv = iv_ref[pl.ds(start, block_rows), :]
    x = x_ref[...].astype(jnp.float32)
    o_ref[...] = ((x - m) * iv).astype(o_ref.dtype)


def _mvn_gray3_kernel(s_ref, x_ref, o_ref):
    """Fused gray->RGB: read the single-channel block once, write 3 channel
    planes with per-channel stats. s_ref is (2, 3) = [mean_c; inv_var_c] in SMEM."""
    x = x_ref[...].astype(jnp.float32)
    for c in range(3):
        o_ref[:, c, :] = ((x - s_ref[0, c]) * s_ref[1, c]).astype(o_ref.dtype)


# ---------------------------------------------------------------------------
# Host-side block sizing
# ---------------------------------------------------------------------------

def _cdiv(a, b):
    return -(-a // b)


def _round_up(a, m):
    return _cdiv(a, m) * m


def _vmem_budget():
    """Return (target (in+out) bytes per block, vmem_limit_bytes) per generation."""
    try:
        vmem_phys = int(pltpu.get_tpu_info().vmem_capacity_bytes)
    except Exception:
        vmem_phys = 64 * 1024 * 1024          # conservative: assume 64-MiB-VMEM chip
    if vmem_phys <= 64 * 1024 * 1024:
        # v7x-class: ~28 MB with default double buffering, headroom for scratch.
        return 14 * 1024 * 1024, 48 * 1024 * 1024
    # v5e / v6e (128 MiB physical VMEM): larger blocks amortize per-step overhead.
    return 16 * 1024 * 1024, 96 * 1024 * 1024


def _pick_blocks(R, L, cell_bytes, target_bytes):
    """Pick (block_rows, tile_L) for a (R, L) slab.

    block_rows is a multiple of 8 (or the full R); tile_L is the full L or a
    multiple of 128 (unmasked full-lane stores). If even an 8-row full-width
    block would blow the VMEM budget the lane axis is tiled instead of
    overshooting. The grid is also forced to >= 2 steps when cheap (megacore).
    """
    row_bytes = L * cell_bytes
    if L <= 128 or 8 * row_bytes <= target_bytes:
        rows = max(1, target_bytes // max(1, row_bytes))
        block_rows = R if rows >= R else max(8, (rows // 8) * 8)
        tile_L = L
    else:
        block_rows = min(R, 8)
        lanes = max(128, target_bytes // max(1, block_rows * cell_bytes))
        tile_L = min(L, max(128, (lanes // 128) * 128))

    if _cdiv(R, block_rows) * _cdiv(L, tile_L) < 2:
        if R > 8:
            block_rows = max(8, _round_up(_cdiv(R, 2), 8))
        elif tile_L == L and L >= 256:
            tile_L = max(128, _round_up(L // 2, 128))
    return block_rows, tile_L


# ---------------------------------------------------------------------------
# pallas_call wrappers
# ---------------------------------------------------------------------------

def _normalize_scalar2d(x2, mean_s, inv_var_s, out_dtype):
    R, L = x2.shape
    target_bytes, vmem_limit = _vmem_budget()
    cell = jnp.dtype(x2.dtype).itemsize + jnp.dtype(out_dtype).itemsize
    br, tl = _pick_blocks(R, L, cell, target_bytes)
    grid = (_cdiv(R, br), _cdiv(L, tl))
    stats = jnp.concatenate([jnp.ravel(mean_s), jnp.ravel(inv_var_s)]).astype(jnp.float32)
    return pl.pallas_call(
        _mvn_scalar_kernel,
        out_shape=jax.ShapeDtypeStruct((R, L), out_dtype),
        grid=grid,
        in_specs=[pl.BlockSpec(memory_space=pltpu.MemorySpace.SMEM),
                  pl.BlockSpec((br, tl), lambda i, j: (i, j))],
        out_specs=pl.BlockSpec((br, tl), lambda i, j: (i, j)),
        compiler_params=pltpu.CompilerParams(
            dimension_semantics=("parallel", "parallel"),
            vmem_limit_bytes=vmem_limit),
    )(stats, x2)


def _normalize_rows2d(x2, mean_rows, inv_var_rows, out_dtype):
    R, L = x2.shape
    target_bytes, vmem_limit = _vmem_budget()
    cell = jnp.dtype(x2.dtype).itemsize + jnp.dtype(out_dtype).itemsize
    br, tl = _pick_blocks(R, L, cell, target_bytes)
    grid = (_cdiv(R, br), _cdiv(L, tl))
    # Per-row stats stay VMEM-resident for the whole grid (constant index_map);
    # pad to grid_R*br so the in-kernel pl.ds slice of a partial last row-block
    # stays in bounds.
    r_pad = _cdiv(R, br) * br
    m = jnp.zeros((r_pad, 1), jnp.float32).at[:R, 0].set(mean_rows.astype(jnp.float32))
    iv = jnp.ones((r_pad, 1), jnp.float32).at[:R, 0].set(inv_var_rows.astype(jnp.float32))
    s_spec = pl.BlockSpec((r_pad, 1), lambda i, j: (0, 0))
    return pl.pallas_call(
        functools.partial(_mvn_rowstat_kernel, block_rows=br),
        out_shape=jax.ShapeDtypeStruct((R, L), out_dtype),
        grid=grid,
        in_specs=[s_spec, s_spec,
                  pl.BlockSpec((br, tl), lambda i, j: (i, j))],
        out_specs=pl.BlockSpec((br, tl), lambda i, j: (i, j)),
        compiler_params=pltpu.CompilerParams(
            dimension_semantics=("parallel", "parallel"),
            vmem_limit_bytes=vmem_limit),
    )(m, iv, x2)


def _normalize_gray3(x1, mean3, inv_var3, out_dtype):
    N, L = x1.shape
    target_bytes, vmem_limit = _vmem_budget()
    # The (br, 3, tl) output block pads its 3-wide sublane dim to 8 in VMEM.
    cell = jnp.dtype(x1.dtype).itemsize + 8 * jnp.dtype(out_dtype).itemsize
    br, tl = _pick_blocks(N, L, cell, target_bytes)
    grid = (_cdiv(N, br), _cdiv(L, tl))
    stats = jnp.stack([mean3, inv_var3]).astype(jnp.float32)   # (2, 3) -> SMEM
    return pl.pallas_call(
        _mvn_gray3_kernel,
        out_shape=jax.ShapeDtypeStruct((N, 3, L), out_dtype),
        grid=grid,
        in_specs=[pl.BlockSpec(memory_space=pltpu.MemorySpace.SMEM),
                  pl.BlockSpec((br, tl), lambda i, j: (i, j))],
        out_specs=pl.BlockSpec((br, 3, tl), lambda i, j: (i, 0, j)),
        compiler_params=pltpu.CompilerParams(
            dimension_semantics=("parallel", "parallel"),
            vmem_limit_bytes=vmem_limit),
    )(stats, x1)


# ---------------------------------------------------------------------------
# Module-equivalent wrapper
# ---------------------------------------------------------------------------

def neko_concat_mvn(imagelist, mean=(127.5,), var=(128.0,), out_dtype=jnp.float32):
    """JAX/Pallas equivalent of neko_concat_dev.forward (non-2dstat branch).

    out_dtype=jnp.bfloat16 halves the dominant HBM write if the consumer
    tolerates it; defaults to float32 to match the PyTorch module.
    """
    mean = jnp.asarray(mean, jnp.float32).reshape(-1)
    var = jnp.asarray(var, jnp.float32).reshape(-1)
    inv_var = 1.0 / var

    first = jnp.asarray(imagelist[0])
    if first.ndim == 3:
        # list of HWC images -> NHWC in the native dtype (cast happens in-kernel).
        x = jnp.stack([jnp.asarray(i) for i in imagelist])
        n, h, w, c = x.shape
        if c == 1:
            # gray -> 3 channels, fused into the kernel: matches the PyTorch
            # subtract-then-repeat (scalar mean) / broadcast (3-entry mean) order.
            if mean.size not in (1, 3) or var.size not in (1, 3):
                raise ValueError("gray input needs 1- or 3-entry mean/var")
            m3 = jnp.broadcast_to(mean, (3,))
            iv3 = jnp.broadcast_to(inv_var, (3,))
            out = _normalize_gray3(x.reshape(n, h * w), m3, iv3, out_dtype)
            return out.reshape(n, 3, h, w)
        # TODO(synk): the NHWC->NCHW permute stays a separate XLA pass; fusing it
        # into the kernel DMA needs a C-strided sub-128-lane gather that lowers
        # poorly on TPU, so NCHW inputs remain the fast path.
        x = jnp.transpose(x, (0, 3, 1, 2))
    elif first.ndim == 4:
        x = jnp.concatenate([jnp.asarray(i) for i in imagelist], axis=0)
    else:
        # TODO(synk): 2-D grayscale path uses cv2.cvtColor; no clean in-kernel equivalent.
        raise NotImplementedError("2-D grayscale (cv2) inputs are not supported")

    n, c, h, w = x.shape
    if mean.size not in (1, c) or var.size not in (1, c):
        raise ValueError(
            f"mean/var must have 1 or {c} entries, got {mean.size}/{var.size}")

    if mean.size == 1 and var.size == 1:
        # scalar stats: fold everything but the batch into the lane axis for the
        # widest possible unmasked stores.
        out2 = _normalize_scalar2d(x.reshape(n, c * h * w), mean, inv_var, out_dtype)
    else:
        # per-channel stats: one row per (n, c) image plane.
        mr = jnp.tile(jnp.broadcast_to(mean, (c,)), n)
        ivr = jnp.tile(jnp.broadcast_to(inv_var, (c,)), n)
        out2 = _normalize_rows2d(x.reshape(n * c, h * w), mr, ivr, out_dtype)
    return out2.reshape(n, c, h, w)


if __name__ == "__main__":
    key = jax.random.PRNGKey(0)
    k1, k2, k3, k4, k5, k6 = jax.random.split(key, 6)

    # --- path 1: list of NCHW batches, scalar mean/var (module defaults) ---
    img_a = jax.random.uniform(k1, (2, 3, 16, 16), jnp.float32, 0.0, 255.0)
    img_b = jax.random.uniform(k2, (2, 3, 16, 16), jnp.float32, 0.0, 255.0)
    out = jax.block_until_ready(neko_concat_mvn([img_a, img_b]))
    x_ref = jnp.concatenate([img_a, img_b], axis=0)
    ref = (x_ref - 127.5) / 128.0
    assert out.shape == (4, 3, 16, 16) and out.dtype == jnp.float32
    assert jnp.allclose(out, ref, atol=1e-5, rtol=1e-5)

    # --- path 2: list of HWC images, per-channel mean/var ---
    hwc_a = jax.random.uniform(k3, (16, 16, 3), jnp.float32, 0.0, 255.0)
    hwc_b = jax.random.uniform(k4, (16, 16, 3), jnp.float32, 0.0, 255.0)
    mean3 = (120.0, 125.0, 130.0)
    var3 = (60.0, 70.0, 80.0)
    out3 = jax.block_until_ready(neko_concat_mvn([hwc_a, hwc_b], mean3, var3))
    x3 = jnp.transpose(jnp.stack([hwc_a, hwc_b]), (0, 3, 1, 2))
    m3 = jnp.asarray(mean3)[None, :, None, None]
    v3 = jnp.asarray(var3)[None, :, None, None]
    assert out3.shape == (2, 3, 16, 16)
    assert jnp.allclose(out3, (x3 - m3) / v3, atol=1e-4, rtol=1e-5)

    # --- path 3: list of gray HWC images -> fused 3-channel output ---
    g_a = jax.random.uniform(k5, (16, 16, 1), jnp.float32, 0.0, 255.0)
    g_b = jax.random.uniform(k6, (16, 16, 1), jnp.float32, 0.0, 255.0)
    outg = jax.block_until_ready(neko_concat_mvn([g_a, g_b], (127.5,), var3))
    xg = jnp.transpose(jnp.stack([g_a, g_b]), (0, 3, 1, 2))   # (2, 1, 16, 16)
    refg = jnp.repeat(xg - 127.5, 3, axis=1) / v3
    assert outg.shape == (2, 3, 16, 16)
    assert jnp.allclose(outg, refg, atol=1e-4, rtol=1e-5)

    print("KERNEL_OK")
</pallas_src>

<mosaic_0001>
module attributes {stable_mosaic.version = 11 : i64} {
  func.func @_mvn_scalar_kernel(%arg0: i32, %arg1: i32, %arg2: memref<2xf32, #tpu.memory_space<smem>>, %arg3: memref<4x384xf32, #tpu.memory_space<vmem>>, %arg4: memref<4x384xf32, #tpu.memory_space<vmem>>) attributes {dimension_semantics = [#tpu.dimension_semantics<parallel>, #tpu.dimension_semantics<parallel>], iteration_bounds = array<i64: 1, 2>, scalar_prefetch = 0 : i64, scratch_operands = 0 : i64, tpu.core_type = #tpu.core_type<tc>, window_params = [{transform_indices = @transform_0, window_bounds = array<i64: 2>}, {transform_indices = @transform_1, window_bounds = array<i64: 4, 384>}, {transform_indices = @transform_2, window_bounds = array<i64: 4, 384>}]} {
    %c0 = arith.constant 0 : index
    %c0_0 = arith.constant 0 : index
    %0 = vector.load %arg3[%c0, %c0_0] : memref<4x384xf32, #tpu.memory_space<vmem>>, vector<4x384xf32>
    %c0_1 = arith.constant 0 : index
    %1 = memref.load %arg2[%c0_1] : memref<2xf32, #tpu.memory_space<smem>>
    %2 = vector.broadcast %1 : f32 to vector<4x384xf32>
    %3 = arith.subf %0, %2 : vector<4x384xf32>
    %c1 = arith.constant 1 : index
    %4 = memref.load %arg2[%c1] : memref<2xf32, #tpu.memory_space<smem>>
    %5 = vector.broadcast %4 : f32 to vector<4x384xf32>
    %6 = arith.mulf %3, %5 : vector<4x384xf32>
    %c0_2 = arith.constant 0 : index
    %c0_3 = arith.constant 0 : index
    %7 = vector.load %arg4[%c0_2, %c0_3] : memref<4x384xf32, #tpu.memory_space<vmem>>, vector<4x384xf32>
    tpu.vector_store %arg4[%c0_2, %c0_3], %6 {strides = array<i32>} : memref<4x384xf32, #tpu.memory_space<vmem>>, vector<4x384xf32>,
    return
  }
  func.func @transform_0(%arg0: i32, %arg1: i32) -> i32 {
    %c0_i32 = arith.constant 0 : i32
    %c0_i32_0 = arith.constant 0 : i32
    return %c0_i32 : i32
  }
  func.func @transform_1(%arg0: i32, %arg1: i32) -> (i32, i32) {
    %c0_i32 = arith.constant 0 : i32
    return %arg0, %arg1 : i32, i32
  }
  func.func @transform_2(%arg0: i32, %arg1: i32) -> (i32, i32) {
    %c0_i32 = arith.constant 0 : i32
    return %arg0, %arg1 : i32, i32
  }
}

</mosaic_0001>

<bundles_post_ra>
// kernel: tpu_custom_call.1
= control target key start
LH: loop header
LB: loop body
LE: loop exit
PB: predicated region body
PF: predicated region fallthrough
CT: control target
= control target key end

     0   :  { %7 = vsyncpa [#allocation5], 0  ;;  %s704_s0 = inlined_call_operand.hbm [shape: f32[2], index: 0, kind: input, shape index: {}]   ;;  %s705_s1 = inlined_call_operand.hbm [shape: f32[4,768], index: 1, kind: input, shape index: {}]   ;;  %s706_s2 = inlined_call_operand.hbm [shape: f32[4,768], index: 2, kind: output, shape index: {}]  }
   0x1   :  { %8 = vsyncpa [#allocation3], 0 }
   0x2   :  { %10 = vsyncpa [#allocation3 + $0x1], 0 }
   0x3   :  { %11 = vsyncpa [#allocation4], 0 }
   0x4   :  { %13 = vsyncpa [#allocation4 + $0x1], 0  ;;  %s561_s9 = smov 0   ;;  %s563_s10 = smov 0  }
   0x5   :  { %s565_s11 = smov 0   ;;  %s567_s12 = smov 0  }
   0x6   :  { %s569_s13 = smov 0   ;;  %s571_s14 = smov 0  }
   0x7 LB: > { %s323_s15 = sadd.s32 4294967295, %s543_s14   ;;  %s324_s16 = sadd.s32 4294967294, %s543_s14   ;;  %s543_s14 = sphi %s571_s14, %s19_s14   ;;  %s539_s13 = sphi %s569_s13, %s718_s13   ;;  %s535_s12 = sphi %s567_s12, %s717_s12   ;;  %s531_s11 = sphi %s565_s11, %s716_s11   ;;  %s527_s10 = sphi %s563_s10, %s715_s10   ;;  %s523_s9 = sphi %s561_s9, %s714_s9  }
   0x8   : > { %p74_p0 = scmp.ne.s32.totalorder %s527_s10, %s523_s9  ;;  %p595_p1 = scmp.eq.s32.totalorder %s323_s15, 0 }
   0x9   : > { %p599_p2 = scmp.eq.s32.totalorder %s323_s15, 1  ;;  %p106_p3 = scmp.eq.s32.totalorder %s324_s16, 1 }
   0xa   : > { %p605_p4 = por %p595_p1, %p74_p0  ;;  %p325_p5 = scmp.ge.s32.totalorder %s543_s14, 1 }
   0xb   : > { %p610_p6 = por %p106_p3, %p74_p0  ;;  %p113_p7 = scmp.lt.s32.totalorder %s543_s14, 3 }
   0xc   : > { %s125_s23 = sshll.u32 %s704_s0, 4  ;;  %s28_s25 = sadd.s32 1, %s539_s13  ;;  %s126_s23 = int_to_ptr.hbm [resolvable:$true] %s125_s23 }
   0xd   : > { %p618_p8 = pnand %p325_p5, %p113_p7  ;;  %s61_s26 = sadd.s32 1, %s531_s11 }
   0xe   : > { %p29_p12 = scmp.ge.s32.totalorder %s28_s25, 2  ;;  %s545_s27 = smov [#allocation2]  }
   0xf   : > { %p347_p10 = pneg %p618_p8  ;;  %p68_p13 = scmp.ne.s32.totalorder %s531_s11, %s527_s10 }
  0x10   : > { %s720_s25 = smov (%p29_p12, %s28_s25), 0  ;;  %p69_p0 = scmp.eq.s32.totalorder %s543_s14, 0 }
  0x11   : > { %p348_p11 = pnand %p347_p10, %p595_p1  ;;  %s57_s28 = ssub.s32 %s539_s13, %s720_s25 }
  0x12   : > { %p360_p3 = scmp.lt.s32.totalorder %s543_s14, 2  ;;  %p59_p5 = scmp.eq.s32.totalorder %s57_s28, 0 }
  0x13   : > { %350 = dma.hbm_to_smem (!%p348_p11), %s126_s23, 16, %s545_s27, [#allocation5]  }
  0x14   : > { %p70_p7 = por %p69_p0, %p68_p13  ;;  %p639_p9 = por %p599_p2, %p68_p13 }
  0x15   : > { %s136_s30 = sand.u32 1, %s531_s11   ;;  %s335_s5 = smul.u32 12, %s539_s13 }
  0x16   : > { %s645_s3 = scalar_select %p59_p5, %s531_s11, %s61_s26  }
  0x17   : > { %s337_s4 = smul.u32 12, %s136_s30  ;;  %p352_p10 = pnand %p360_p3, %p70_p7 }
  0x18   : > { %s147_s8 = scalar_lea.hbm %s705_s1, %s335_s5  ;;  %s137_s18 = scalar_lea.sflag [#allocation3], %s136_s30 }
  0x19   : > { %s140_s15 = scalar_lea.vmem [#allocation6], %s337_s4  ;;  %s149_s21 = sshll.u32 %s147_s8, 4  ;;  %s150_s21 = int_to_ptr.hbm [resolvable:$true] %s149_s21 }
  0x1a   : > { %s151_s16 = sshll.u32 %s140_s15, 4  ;;  %160 = sbr.rel (%p618_p8) target bundleno = 55 (0x37), region = 28  ;;  %s152_s16 = int_to_ptr.vmem [resolvable:$true] %s151_s16 }
  0x1b   : > { %354 = dma.hbm_to_vmem [thread:$0]  (!%p352_p10), %s150_s21, 192, %s152_s16, %s137_s18  }
  0x1f   : > { %510 = dma.done.wait (%p595_p1), [#allocation5], 16  }
  0x20   : > { %512 = vsyncadd (%p595_p1), [#allocation5], 4294967280  ;;  %s658_s22 = sand.u32 1, %s527_s10  }
  0x21   : > { %s338_s23 = smul.u32 12, %s658_s22  ;;  %s168_s26 = scalar_lea.sflag [#allocation3], %s658_s22 }
  0x23   : > { %s171_s27 = scalar_lea.vmem [#allocation6], %s338_s23 }
  0x24   : > { %514 = dma.done.wait (%p605_p4), %s168_s26, 192  }
  0x25   : > { %516 = vsyncadd (%p605_p4), %s168_s26, 4294967104 }
  0x26   : > { %177 = sfence }
  0x27   : > { %s198_s24 = sld [smem:[#allocation2]]  ;;  %s336_s17 = smul.u32 12, %s535_s12  ;;  %v196_v0 = vld [vmem:[%s171_s27] sm:$0xff]  ;;  %v197_v1 = vld [vmem:[%s171_s27 + $0x8] sm:$0xf] }
  0x28   : > { %s331_s28 = sld [smem:[#allocation2 + $0x1]]  ;;  %s193_s6 = scalar_lea.vmem [#allocation7], %s338_s23 }
  0x29   : > { %s222_s5 = scalar_lea.hbm %s706_s2, %s336_s17  ;;  %s224_s7 = sshll.u32 %s193_s6, 4  ;;  %s225_s7 = int_to_ptr.vmem [resolvable:$true] %s224_s7 }
  0x2a   : > { %s226_s19 = sshll.u32 %s222_s5, 4  ;;  %s209_s12 = scalar_lea.sflag [#allocation4], %s658_s22  ;;  %s227_s19 = int_to_ptr.hbm [resolvable:$true] %s226_s19 }
  0x2b   : > { %s471_s8 = sshra.s32 %s227_s19, 4  ;;  %s477_s18 = scalar_lea.hbm %s706_s2, 24  ;;  %s472_s8 = int_to_ptr.hbm [resolvable:$true] %s471_s8 }
  0x2c   : > { %s473_s15 = scalar_lea.hbm %s472_s8, 12  ;;  %p478_p8 = scmp.lt.s32.totalorder %s472_s8, %s706_s2 }
  0x2d   : > { %v199_v2 = vstv %s198_s24  ;;  %p474_p1 = scmp.ne.s32.totalorder %s472_s8, %s473_s15  ;;  %p479_p11 = scmp.lt.s32.totalorder %s477_s18, %s473_s15 }
  0x2e   : > { %v200_v3 = vsub.f32 %v196_v0, %v199_v2  ;;  %v203_v4 = vstv %s331_s28  ;;  %v201_v5 = vsub.f32 %v197_v1, %v199_v2 }
  0x2f   : > { %p475_p2 = pnand %p474_p1, %p639_p9  ;;  %p480_p12 = por %p479_p11, %p478_p8 }
  0x30   : > { %v204_v6 = vmul.f32 %v203_v4, %v200_v3  ;;  %v205_v7 = vmul.f32 %v203_v4, %v201_v5 }
  0x31   : > { %p476_p4 = pneg %p475_p2 }
  0x32   : > { %206 = vst [vmem:[%s193_s6] sm:$0xff] %v204_v6 }
  0x33   : > { %207 = vst [vmem:[%s193_s6 + $0x8] sm:$0xf] %v205_v7  ;;  %p481_p13 = pnand %p480_p12, %p476_p4 }
  0x35   : > { %484 = shalt.err (!%p481_p13)
}
  0x36   : > { %345 = dma.vmem_to_hbm [thread:$0]  (%p639_p9), %s225_s7, 192, %s227_s19, %s209_s12  }
  0x37 PF: > { %s238_s22 = sand.u32 1, %s523_s9   ;;  %p713_p0 = scmp.ge.s32.totalorder %s543_s14, 2 }
  0x38   : > { %s239_s27 = scalar_lea.sflag [#allocation4], %s238_s22 }
  0x39   : > { %p356_p3 = pnand %p713_p0, %p610_p6 }
  0x3b   : > { %p357_p5 = pneg %p356_p3 }
  0x3d   : > { %518 = dma.done.wait (%p357_p5), %s239_s27, 192  }
  0x3e   : > { %520 = vsyncadd (%p357_p5), %s239_s27, 4294967104  ;;  %s19_s14 = sadd.s32 1, %s543_s14   ;;  %s714_s9 = smov %s527_s10 }
  0x3f   : > { %p16_p7 = scmp.ge.s32.totalorder %s19_s14, 4   ;;  %s715_s10 = smov %s531_s11 }
  0x40   : > { %s716_s11 = smov %s645_s3  ;;  %s717_s12 = smov %s539_s13 }
  0x41   : > { %s718_s13 = smov %s720_s25  ;;  %18 = sbr.rel (!%p16_p7) target bundleno = 7 (0x7), region = 78 }
  0x46   :  { %245 = vsyncpa [#allocation3], 1 }
  0x47   :  { %247 = vsyncpa [#allocation3 + $0x1], 1 }
  0x48   :  { %248 = vsyncpa [#allocation4], 1 }
  0x49   :  { %250 = vsyncpa [#allocation4 + $0x1], 1 }
  0x4a   :  { %251 = vsyncpa [#allocation5], 1 }
  0x4b   :  { %253 = vsyncpa [#allocation5 + $0x1], 1 }

</bundles_post_ra>
